<compile_context>
chip_gen: v7x
topology: tpu7x:2x2x1
jax: 0.10.0
libtpu: 0.0.40
codegen_flags: <defaults>
</compile_context>

<pallas_src>
import numpy as np
import jax
import jax.numpy as jnp
from jax.experimental import pallas as pl
from jax.experimental.pallas import tpu as pltpu


# ----------------------------- Pallas kernel ------------------------------ #

def influence_forward_pallas(adj, emb_flat, w_pad, *, train_year, emb_out_size):
    """adj:      [B, R*T*N] f32  b-major adjacency, columns ordered (r, t, n)
       emb_flat: [T*N, G]   f32  year-flattened node embeddings
       w_pad:    [R, G, Epad] f32 per-relation weights, zero-padded E -> 128
       Returns the module output [B, E] (lane padding stripped)."""
    B, RTN = adj.shape
    TN, G = emb_flat.shape
    R, G2, Epad = w_pad.shape
    assert G2 == G and RTN == R * TN
    inv_t = 1.0 / float(train_year)

    def kernel(adj_ref, emb_ref, w_ref, o_ref):
        emb = emb_ref[...]                                       # [T*N, G]
        # R small projection matmuls; concat along sublanes (tile-aligned).
        proj = jnp.concatenate(
            [jnp.dot(emb, w_ref[r], preferred_element_type=jnp.float32)
             for r in range(R)],
            axis=0)                                              # [R*T*N, Epad]
        # ONE matmul fuses the neighbor sum, the year mean (1/T) and the
        # relation sum:  [B, R*T*N] @ [R*T*N, Epad]  ->  lane-dense store.
        o_ref[...] = jnp.dot(adj_ref[...], proj,
                             preferred_element_type=jnp.float32) * inv_t

    out = pl.pallas_call(
        kernel,
        out_shape=jax.ShapeDtypeStruct((B, Epad), jnp.float32),
        grid_spec=pltpu.PrefetchScalarGridSpec(
            num_scalar_prefetch=0,
            grid=(1,),                       # single step: everything fits VMEM
            in_specs=[
                pl.BlockSpec((B, RTN), lambda i: (0, 0)),
                pl.BlockSpec((TN, G), lambda i: (0, 0)),
                pl.BlockSpec((R, G, Epad), lambda i: (0, 0, 0)),
            ],
            out_specs=pl.BlockSpec((B, Epad), lambda i: (0, 0)),
        ),
        compiler_params=pltpu.CompilerParams(
            dimension_semantics=("arbitrary",)),
    )(adj, emb_flat, w_pad)

    return out[:, :emb_out_size]             # strip lane padding


# ------------------------------- JAX glue ---------------------------------- #

def xavier_uniform(key, shape):
    fan_in, fan_out = shape
    bound = float(np.sqrt(6.0 / (fan_in + fan_out)))
    return jax.random.uniform(key, shape, jnp.float32, -bound, bound)


def init_params(key, graph_emb_size, influence_emb_size, num_rel):
    # TODO(synk): the real module's weights act on the TACN output
    # (output_size=64); with the TACN approximated away they act on G.
    keys = jax.random.split(key, num_rel)
    return [xavier_uniform(keys[i], (graph_emb_size, influence_emb_size))
            for i in range(num_rel)]


def prepare_dense_inputs(neighbors, alignment, input_ids, train_year, num_rel,
                         num_nodes, weights, graph_emb_size, e_pad):
    """Lower the ragged neighbor / alignment structure into a dense b-major
    adjacency [B, R*T*N] (column index = r*T*N + t*N + n, duplicate-counting),
    and build the zero-padded stacked weight tensor [R, G, e_pad]."""
    B = len(input_ids)
    R, T, N = num_rel, train_year, num_nodes

    rows, cols = [], []
    for b, node in enumerate(input_ids):
        for r in range(R):
            nbrs = np.asarray(neighbors[int(node)][r], np.int64)
            if nbrs.size == 0:                      # module's `continue`
                continue
            al = np.asarray(alignment)[nbrs]        # [deg, T]
            for t in range(T):
                a = al[:, t]
                valid = a >= 0
                nvalid = int(valid.sum())
                if nvalid == 0:
                    continue
                rows.append(np.full(nvalid, b, np.int64))
                cols.append(r * T * N + t * N + a[valid])
    adj = np.zeros((B, R * T * N), np.float32)
    if rows:
        np.add.at(adj, (np.concatenate(rows), np.concatenate(cols)), 1.0)

    E = weights[0].shape[1]
    w_pad = np.zeros((R, graph_emb_size, e_pad), np.float32)
    for r, w in enumerate(weights):
        w_pad[r, :, :E] = np.asarray(w, np.float32)

    return jnp.asarray(adj), jnp.asarray(w_pad), E


def reference_forward(embeddings, train_year, neighbors, alignment,
                      input_ids, weights):
    """Pure numpy (f32) transcription of the approximated forward pass."""
    emb = np.asarray(embeddings, np.float32)
    ws = [np.asarray(w, np.float32) for w in weights]
    G = emb.shape[-1]
    E = ws[0].shape[-1]
    outs = []
    for node in input_ids:
        acc = np.zeros(E, np.float32)
        for r, W in enumerate(ws):
            nbrs = neighbors[int(node)][r]
            if len(nbrs) == 0:
                continue
            states = []
            for nb in nbrs:
                seq = []
                for t in range(train_year):
                    a = int(alignment[nb, t])
                    seq.append(emb[t, a] if a >= 0
                               else np.zeros(G, np.float32))
                states.append(np.stack(seq).mean(0))   # TACN stand-in
            states = np.stack(states)                   # [deg, G]
            acc = acc + (states @ W).sum(0)              # sum over neighbors
        outs.append(acc)
    return np.stack(outs)                                # [B, E]


# --------------------------------- main ------------------------------------ #

if __name__ == "__main__":
    influence_emb_size = 32   # E
    graph_emb_size = 32       # G
    num_rel = 4               # R  (citedBy, cites, coAuthor, venue)
    train_year = 2            # T
    num_nodes = 16            # N  (graph nodes / embedding rows per year)
    batch = 8                 # B
    e_pad = 128               # lane-dense weight / output width

    key = jax.random.PRNGKey(0)
    k_emb, k_w, k_ids = jax.random.split(key, 3)

    embeddings = jax.random.normal(
        k_emb, (train_year, num_nodes, graph_emb_size), jnp.float32)
    weights = init_params(k_w, graph_emb_size, influence_emb_size, num_rel)
    input_ids = np.asarray(
        jax.random.randint(k_ids, (batch,), 0, num_nodes)).tolist()

    # Deterministic ragged neighbor structure:
    #   neighbors[node][rel]  -> list of neighbor node ids (some lists empty)
    #   alignment[node, year] -> embedding row for that year, or -1 (missing)
    rng = np.random.default_rng(0)
    neighbors = {}
    for n in range(num_nodes):
        per_rel = []
        for r in range(num_rel):
            deg = int(rng.integers(0, 6))
            per_rel.append(rng.integers(0, num_nodes, size=deg).tolist())
        neighbors[n] = per_rel
    alignment = rng.integers(0, num_nodes, size=(num_nodes, train_year))
    alignment = np.where(rng.random((num_nodes, train_year)) < 0.25,
                         -1, alignment).astype(np.int64)

    adj, w_pad, E = prepare_dense_inputs(
        neighbors, alignment, input_ids, train_year, num_rel, num_nodes,
        weights, graph_emb_size, e_pad)
    emb_flat = embeddings.reshape(train_year * num_nodes, graph_emb_size)

    out = influence_forward_pallas(
        adj, emb_flat, w_pad, train_year=train_year, emb_out_size=E)
    out = jax.block_until_ready(out)

    ref = reference_forward(embeddings, train_year, neighbors, alignment,
                            input_ids, weights)

    assert out.shape == (batch, influence_emb_size), out.shape
    # Tight tolerance: all-f32 path now (no intermediate bf16 cast).
    np.testing.assert_allclose(np.asarray(out, np.float32), ref,
                               rtol=1e-3, atol=1e-3)
    print("KERNEL_OK")
</pallas_src>

<mosaic_0001>
module attributes {stable_mosaic.version = 11 : i64} {
  func.func @kernel(%arg0: i32, %arg1: memref<8x128xf32, #tpu.memory_space<vmem>>, %arg2: memref<32x32xf32, #tpu.memory_space<vmem>>, %arg3: memref<4x32x128xf32, #tpu.memory_space<vmem>>, %arg4: memref<8x128xf32, #tpu.memory_space<vmem>>) attributes {dimension_semantics = [#tpu.dimension_semantics<arbitrary>], iteration_bounds = array<i64: 1>, scalar_prefetch = 0 : i64, scratch_operands = 0 : i64, tpu.core_type = #tpu.core_type<tc>, window_params = [{pipeline_mode = #tpu.pipeline_mode<synchronous>, transform_indices = @transform_0, window_bounds = array<i64: 8, 128>}, {pipeline_mode = #tpu.pipeline_mode<synchronous>, transform_indices = @transform_1, window_bounds = array<i64: 32, 32>}, {pipeline_mode = #tpu.pipeline_mode<synchronous>, transform_indices = @transform_2, window_bounds = array<i64: 4, 32, 128>}, {pipeline_mode = #tpu.pipeline_mode<synchronous>, transform_indices = @transform_3, window_bounds = array<i64: 8, 128>}]} {
    %c0 = arith.constant 0 : index
    %c0_0 = arith.constant 0 : index
    %0 = vector.load %arg2[%c0, %c0_0] : memref<32x32xf32, #tpu.memory_space<vmem>>, vector<32x32xf32>
    %c0_1 = arith.constant 0 : index
    %c0_2 = arith.constant 0 : index
    %c0_3 = arith.constant 0 : index
    %1 = vector.load %arg3[%c0_1, %c0_2, %c0_3] : memref<4x32x128xf32, #tpu.memory_space<vmem>>, vector<1x32x128xf32>
    %2 = vector.shape_cast %1 : vector<1x32x128xf32> to vector<32x128xf32>
    %cst = arith.constant dense<0.000000e+00> : vector<32x128xf32>
    %3 = tpu.matmul %0, %2, %cst {dimension_numbers = #tpu.dot_dimension_numbers<[1], [0], [0], [1], [0, 0, 1, 1], [], []>} : vector<32x32xf32>, vector<32x128xf32>, vector<32x128xf32> -> vector<32x128xf32>
    %c1 = arith.constant 1 : index
    %c0_4 = arith.constant 0 : index
    %c0_5 = arith.constant 0 : index
    %4 = vector.load %arg3[%c1, %c0_4, %c0_5] : memref<4x32x128xf32, #tpu.memory_space<vmem>>, vector<1x32x128xf32>
    %5 = vector.shape_cast %4 : vector<1x32x128xf32> to vector<32x128xf32>
    %cst_6 = arith.constant dense<0.000000e+00> : vector<32x128xf32>
    %6 = tpu.matmul %0, %5, %cst_6 {dimension_numbers = #tpu.dot_dimension_numbers<[1], [0], [0], [1], [0, 0, 1, 1], [], []>} : vector<32x32xf32>, vector<32x128xf32>, vector<32x128xf32> -> vector<32x128xf32>
    %c2 = arith.constant 2 : index
    %c0_7 = arith.constant 0 : index
    %c0_8 = arith.constant 0 : index
    %7 = vector.load %arg3[%c2, %c0_7, %c0_8] : memref<4x32x128xf32, #tpu.memory_space<vmem>>, vector<1x32x128xf32>
    %8 = vector.shape_cast %7 : vector<1x32x128xf32> to vector<32x128xf32>
    %cst_9 = arith.constant dense<0.000000e+00> : vector<32x128xf32>
    %9 = tpu.matmul %0, %8, %cst_9 {dimension_numbers = #tpu.dot_dimension_numbers<[1], [0], [0], [1], [0, 0, 1, 1], [], []>} : vector<32x32xf32>, vector<32x128xf32>, vector<32x128xf32> -> vector<32x128xf32>
    %c3 = arith.constant 3 : index
    %c0_10 = arith.constant 0 : index
    %c0_11 = arith.constant 0 : index
    %10 = vector.load %arg3[%c3, %c0_10, %c0_11] : memref<4x32x128xf32, #tpu.memory_space<vmem>>, vector<1x32x128xf32>
    %11 = vector.shape_cast %10 : vector<1x32x128xf32> to vector<32x128xf32>
    %cst_12 = arith.constant dense<0.000000e+00> : vector<32x128xf32>
    %12 = tpu.matmul %0, %11, %cst_12 {dimension_numbers = #tpu.dot_dimension_numbers<[1], [0], [0], [1], [0, 0, 1, 1], [], []>} : vector<32x32xf32>, vector<32x128xf32>, vector<32x128xf32> -> vector<32x128xf32>
    %13 = tpu.concatenate %3, %6, %9, %12 in 0 : vector<32x128xf32>, vector<32x128xf32>, vector<32x128xf32>, vector<32x128xf32> -> vector<128x128xf32>
    %c0_13 = arith.constant 0 : index
    %c0_14 = arith.constant 0 : index
    %14 = vector.load %arg1[%c0_13, %c0_14] : memref<8x128xf32, #tpu.memory_space<vmem>>, vector<8x128xf32>
    %cst_15 = arith.constant dense<0.000000e+00> : vector<8x128xf32>
    %15 = tpu.matmul %14, %13, %cst_15 {dimension_numbers = #tpu.dot_dimension_numbers<[1], [0], [0], [1], [0, 0, 1, 1], [], []>} : vector<8x128xf32>, vector<128x128xf32>, vector<8x128xf32> -> vector<8x128xf32>
    %cst_16 = arith.constant 5.000000e-01 : f32
    %16 = vector.broadcast %cst_16 : f32 to vector<8x128xf32>
    %17 = arith.mulf %15, %16 : vector<8x128xf32>
    %c0_17 = arith.constant 0 : index
    %c0_18 = arith.constant 0 : index
    %18 = vector.load %arg4[%c0_17, %c0_18] : memref<8x128xf32, #tpu.memory_space<vmem>>, vector<8x128xf32>
    tpu.vector_store %arg4[%c0_17, %c0_18], %17 {strides = array<i32>} : memref<8x128xf32, #tpu.memory_space<vmem>>, vector<8x128xf32>,
    return
  }
  func.func @transform_0(%arg0: i32) -> (i32, i32) {
    %c0_i32 = arith.constant 0 : i32
    %c0_i32_0 = arith.constant 0 : i32
    %c0_i32_1 = arith.constant 0 : i32
    return %c0_i32, %c0_i32_0 : i32, i32
  }
  func.func @transform_1(%arg0: i32) -> (i32, i32) {
    %c0_i32 = arith.constant 0 : i32
    %c0_i32_0 = arith.constant 0 : i32
    %c0_i32_1 = arith.constant 0 : i32
    return %c0_i32, %c0_i32_0 : i32, i32
  }
  func.func @transform_2(%arg0: i32) -> (i32, i32, i32) {
    %c0_i32 = arith.constant 0 : i32
    %c0_i32_0 = arith.constant 0 : i32
    %c0_i32_1 = arith.constant 0 : i32
    %c0_i32_2 = arith.constant 0 : i32
    return %c0_i32, %c0_i32_0, %c0_i32_1 : i32, i32, i32
  }
  func.func @transform_3(%arg0: i32) -> (i32, i32) {
    %c0_i32 = arith.constant 0 : i32
    %c0_i32_0 = arith.constant 0 : i32
    %c0_i32_1 = arith.constant 0 : i32
    return %c0_i32, %c0_i32_0 : i32, i32
  }
}

</mosaic_0001>

<bundles_post_ra>
// kernel: tpu_custom_call.1
= control target key start
LH: loop header
LB: loop body
LE: loop exit
PB: predicated region body
PF: predicated region fallthrough
CT: control target
= control target key end

     0   :  { %8 = vsyncpa [#allocation3], 0  ;;  %s933_s0 = inlined_call_operand.hbm [shape: f32[8,128], index: 0, kind: input, shape index: {}]   ;;  %s934_s1 = inlined_call_operand.hbm [shape: f32[32,32], index: 1, kind: input, shape index: {}]   ;;  %s935_s2 = inlined_call_operand.hbm [shape: f32[4,32,128], index: 2, kind: input, shape index: {}]   ;;  %s936_s3 = inlined_call_operand.hbm [shape: f32[8,128], index: 3, kind: output, shape index: {}]  }
   0x1   :  { %9 = vsyncpa [#allocation6], 0 }
   0x2   :  { %10 = vsyncpa [#allocation4], 0  ;;  %s834_s12 = smov [#allocation5]   ;;  %s740_s16 = scalar_lea.hbm %s934_s1, 512 }
   0x3   :  { %s26_s13 = sshll.u32 %s834_s12, 4  ;;  %p741_p0 = scmp.ne.s32.totalorder %s934_s1, %s740_s16  ;;  %s27_s13 = int_to_ptr.vmem [resolvable:$true] %s26_s13 }
   0x4   :  { %p744_p1 = scmp.lt.u32.totalorder %s740_s16, %s934_s1 }
   0x6   :  { %p746_p2 = pnand %p744_p1, %p741_p0 }
   0x8   :  { %749 = shalt.err (!%p746_p2)
}
   0x9   :  { %s750_s21 = scalar_lea.vmem %s27_s13, 512  ;;  %p755_p4 = scmp.lt.s32.totalorder %s27_s13, %s27_s13 }
   0xa   :  { %p751_p3 = scmp.ne.s32.totalorder %s27_s13, %s750_s21  ;;  %p756_p5 = scmp.lt.s32.totalorder %s750_s21, %s750_s21 }
   0xc   :  { %p757_p6 = por %p756_p5, %p755_p4 }
   0xe   :  { %p758_p7 = pnand %p757_p6, %p751_p3 }
  0x10   :  { %761 = shalt.err (!%p758_p7)
}
  0x11   :  { %s835_s22 = smov 128   ;;  %s836_s23 = smov 8  }
  0x12   :  { %32 = dma.hbm_to_vmem [thread:$0]  %s934_s1, 512, %s27_s13, [#allocation6], %s835_s22, %s835_s22, %s836_s23  }
  0x13   :  { %s837_s26 = smov [#allocation2]   ;;  %s838_s28 = smov [#allocation7]  }
  0x14   :  { %s17_s27 = sshll.u32 %s837_s26, 4  ;;  %s38_s29 = sshll.u32 %s838_s28, 4  ;;  %s18_s27 = int_to_ptr.vmem [resolvable:$true] %s17_s27  ;;  %s39_s29 = int_to_ptr.vmem [resolvable:$true] %s38_s29 }
  0x15   :  { %s762_s5 = scalar_lea.hbm %s933_s0, 128 }
  0x16   :  { %p763_p8 = scmp.ne.s32.totalorder %s933_s0, %s762_s5  ;;  %p766_p9 = scmp.lt.u32.totalorder %s762_s5, %s933_s0 }
  0x18   :  { %p768_p10 = pnand %p766_p9, %p763_p8 }
  0x1a   :  { %771 = shalt.err (!%p768_p10)
}
  0x1b   :  { %s772_s1 = scalar_lea.vmem %s18_s27, 128  ;;  %p777_p12 = scmp.lt.s32.totalorder %s18_s27, %s18_s27 }
  0x1c   :  { %p773_p11 = scmp.ne.s32.totalorder %s18_s27, %s772_s1  ;;  %p778_p13 = scmp.lt.s32.totalorder %s772_s1, %s772_s1 }
  0x1e   :  { %p779_p0 = por %p778_p13, %p777_p12 }
  0x20   :  { %p780_p1 = pnand %p779_p0, %p773_p11 }
  0x22   :  { %783 = shalt.err (!%p780_p1)
}
  0x23   :  { %20 = dma.hbm_to_vmem [thread:$0]  %s933_s0, 128, %s18_s27, [#allocation3]  }
  0x24   :  { %s784_s14 = scalar_lea.hbm %s935_s2, 2048 }
  0x25   :  { %p785_p2 = scmp.ne.s32.totalorder %s935_s2, %s784_s14  ;;  %p788_p3 = scmp.lt.u32.totalorder %s784_s14, %s935_s2 }
  0x27   :  { %p790_p4 = pnand %p788_p3, %p785_p2 }
  0x29   :  { %793 = shalt.err (!%p790_p4)
}
  0x2a   :  { %s794_s19 = scalar_lea.vmem %s39_s29, 2048  ;;  %p799_p6 = scmp.lt.s32.totalorder %s39_s29, %s39_s29 }
  0x2b   :  { %p795_p5 = scmp.ne.s32.totalorder %s39_s29, %s794_s19  ;;  %p800_p7 = scmp.lt.s32.totalorder %s794_s19, %s794_s19 }
  0x2d   :  { %p801_p8 = por %p800_p7, %p799_p6 }
  0x2f   :  { %p802_p9 = pnand %p801_p8, %p795_p5 }
  0x31   :  { %805 = shalt.err (!%p802_p9)
}
  0x32   :  { %44 = dma.hbm_to_vmem [thread:$0]  %s935_s2, 2048, %s39_s29, [#allocation6], %s835_s22, %s835_s22, %s836_s23  }
  0x33   :  { %828 = dma.done.wait [#allocation3], 128  }
  0x34   :  { %829 = vsyncadd [#allocation3], 4294967168 }
  0x35   :  { %830 = dma.done.wait [#allocation6], 2560  }
  0x36   :  { %831 = vsyncadd [#allocation6], 4294964736  ;;  %vm62_vm0 = vcmask 261120   ;;  %v58_v0 = vld [vmem:[#allocation7] sm:$0xff]  ;;  %v59_v1 = vld [vmem:[#allocation7 + $0x8] sm:$0xff]  ;;  %v839_v28 = vmov 0.0|0.0  }
  0x37   :  { %v60_v2 = vld [vmem:[#allocation7 + $0x10] sm:$0xff]  ;;  %v675_v3 = vpack.c.bf16 %v59_v1, %v58_v0  ;;  %v61_v4 = vld [vmem:[#allocation7 + $0x18] sm:$0xff]  ;;  %v54_v5 = vld [vmem:[#allocation5] sm:$0xff]  ;;  %707 = vmatprep.subr.bf16.mxu0 %v839_v28  ;;  %vm840_vm1 = vmmov 0   ;;  %v841_v29 = vmov 0.0   ;;  %s842_s2 = smov [#allocation8]  }
  0x38   :  { %v679_v6 = vpack.c.bf16 %v61_v4, %v60_v2  ;;  %592 = vmatprep.mubr.msk.f32.mxu1 %vm62_vm0, %v54_v5  ;;  %v161_v7 = vld [vmem:[#allocation7 + $0x20] sm:$0xff]  ;;  %v162_v8 = vld [vmem:[#allocation7 + $0x28] sm:$0xff]  ;;  %v163_v10 = vld [vmem:[#allocation7 + $0x30] sm:$0xff]  ;;  %672 = vmatprep.mubr.msk.f32.mxu0 %vm840_vm1, %v841_v29  ;;  %s509_s21 = sshll.u32 %s842_s2, 4  ;;  %s510_s21 = int_to_ptr.vmem [resolvable:$true] %s509_s21 }
  0x39   :  { %676 = vmatprep.subr.bf16.mxu1 %v675_v3  ;;  %v683_v9 = vpack.c.bf16 %v162_v8, %v161_v7  ;;  %v164_v11 = vld [vmem:[#allocation7 + $0x38] sm:$0xff]  ;;  %v55_v12 = vld [vmem:[#allocation5 + $0x8] sm:$0xff]  ;;  %v56_v13 = vld [vmem:[#allocation5 + $0x10] sm:$0xff]  ;;  %s806_s22 = scalar_lea.vmem %s510_s21, 128  ;;  %p811_p11 = scmp.lt.s32.totalorder %s510_s21, %s510_s21 }
  0x3a   :  { %678 = vmatpush3.bf16.msra.mxu1 %v675_v3  ;;  %v687_v14 = vpack.c.bf16 %v164_v11, %v163_v10  ;;  %v251_v15 = vld [vmem:[#allocation7 + $0x40] sm:$0xff]  ;;  %v252_v16 = vld [vmem:[#allocation7 + $0x48] sm:$0xff]  ;;  %v57_v17 = vld [vmem:[#allocation5 + $0x18] sm:$0xff]  ;;  %p807_p10 = scmp.ne.s32.totalorder %s510_s21, %s806_s22  ;;  %p812_p12 = scmp.lt.s32.totalorder %s806_s22, %s806_s22 }
  0x3b   :  { %680 = vmatprep.subr.bf16.mxu1 %v679_v6  ;;  %v691_v18 = vpack.c.bf16 %v252_v16, %v251_v15  ;;  %v253_v19 = vld [vmem:[#allocation7 + $0x50] sm:$0xff]  ;;  %v254_v20 = vld [vmem:[#allocation7 + $0x58] sm:$0xff]  ;;  %v341_v22 = vld [vmem:[#allocation7 + $0x60] sm:$0xff] }
  0x3c   :  { %v695_v21 = vpack.c.bf16 %v254_v20, %v253_v19  ;;  %v342_v23 = vld [vmem:[#allocation7 + $0x68] sm:$0xff]  ;;  %v343_v25 = vld [vmem:[#allocation7 + $0x70] sm:$0xff]  ;;  %v344_v26 = vld [vmem:[#allocation7 + $0x78] sm:$0xff]  ;;  %p813_p13 = por %p812_p12, %p811_p11 }
  0x3d   :  { %v699_v24 = vpack.c.bf16 %v342_v23, %v341_v22  ;;  %v703_v27 = vpack.c.bf16 %v344_v26, %v343_v25  ;;  %v430_v54 = vld [vmem:[#allocation2] sm:$0xff] }
  0x3e   :  { %682 = vmatpush3.bf16.msra.mxu1 %v679_v6  ;;  %p814_p0 = pnand %p813_p13, %p807_p10 }
  0x3f   :  { %684 = vmatprep.subr.bf16.mxu1 %v683_v9 }
  0x41   :  { %593 = vmatmul.mubr.msk.f32.vlgmr.msra.gmra.mrb[0].mxu1 %vm62_vm0, %v55_v12 }
  0x42   :  { %686 = vmatpush3.bf16.msra.mxu1 %v683_v9  ;;  %595 = vmatprep.mubr.msk.f32.mxu1 %vm62_vm0, %v56_v13 }
  0x43   :  { %688 = vmatprep.subr.bf16.mxu1 %v687_v14 }
  0x45   :  { %596 = vmatmul.mubr.msk.f32.gmra.mrb[2].mxu1 %vm62_vm0, %v57_v17 }
  0x46   :  { %690 = vmatpush3.bf16.msra.mxu1 %v687_v14  ;;  %606 = vmatprep.mubr.msk.f32.mxu1 %vm62_vm0, %v54_v5 }
  0x47   :  { %692 = vmatprep.subr.bf16.mxu1 %v691_v18 }
  0x49   :  { %607 = vmatmul.mubr.msk.f32.vlgmr.msra.gmra.mrb[4].mxu1 %vm62_vm0, %v55_v12 }
  0x4a   :  { %694 = vmatpush3.bf16.msra.mxu1 %v691_v18  ;;  %609 = vmatprep.mubr.msk.f32.mxu1 %vm62_vm0, %v56_v13 }
  0x4b   :  { %696 = vmatprep.subr.bf16.mxu1 %v695_v21 }
  0x4d   :  { %610 = vmatmul.mubr.msk.f32.gmra.mrb[6].mxu1 %vm62_vm0, %v57_v17 }
  0x4e   :  { %698 = vmatpush3.bf16.msra.mxu1 %v695_v21  ;;  %620 = vmatprep.mubr.msk.f32.mxu1 %vm62_vm0, %v54_v5 }
  0x4f   :  { %700 = vmatprep.subr.bf16.mxu1 %v699_v24 }
  0x51   :  { %621 = vmatmul.mubr.msk.f32.vlgmr.msra.gmra.mrb[8].mxu1 %vm62_vm0, %v55_v12 }
  0x52   :  { %702 = vmatpush3.bf16.msra.mxu1 %v699_v24  ;;  %623 = vmatprep.mubr.msk.f32.mxu1 %vm62_vm0, %v56_v13 }
  0x53   :  { %704 = vmatprep.subr.bf16.mxu1 %v703_v27 }
  0x55   :  { %624 = vmatmul.mubr.msk.f32.gmra.mrb[10].mxu1 %vm62_vm0, %v57_v17 }
  0x56   :  { %706 = vmatpush3.bf16.msra.mxu1 %v703_v27  ;;  %634 = vmatprep.mubr.msk.f32.mxu1 %vm62_vm0, %v54_v5 }
  0x59   :  { %635 = vmatmul.mubr.msk.f32.vlgmr.msra.gmra.mrb[12].mxu1 %vm62_vm0, %v55_v12 }
  0x5a   :  { %637 = vmatprep.mubr.msk.f32.mxu1 %vm62_vm0, %v56_v13 }
  0x5d   :  { %638 = vmatmul.mubr.msk.f32.gmra.mrb[14].mxu1 %vm62_vm0, %v57_v17 }
 0x114   :  { %v594_v30 = vpop.f32.mrb[0].mxu1 }
 0x115   :  { %v141_v31 = vpop.f32.mrb[1].mxu1 }
 0x116   :  { %v708_v32 = vpack.c.bf16 %v594_v30, %v141_v31 }
 0x118   :  { %v597_v33 = vpop.f32.mrb[2].mxu1  ;;  %709 = vmatpush3.bf16.msra.mxu0 %v708_v32 }
 0x119   :  { %v151_v34 = vpop.f32.mrb[3].mxu1  ;;  %710 = vmatprep.subr.bf16.mxu0 %v839_v28 }
 0x11a   :  { %v711_v35 = vpack.c.bf16 %v597_v33, %v151_v34 }
 0x11c   :  { %v608_v36 = vpop.f32.mrb[4].mxu1  ;;  %712 = vmatpush3.bf16.msra.mxu0 %v711_v35 }
 0x11d   :  { %v231_v37 = vpop.f32.mrb[5].mxu1  ;;  %713 = vmatprep.subr.bf16.mxu0 %v839_v28 }
 0x11e   :  { %v714_v38 = vpack.c.bf16 %v608_v36, %v231_v37 }
 0x120   :  { %v611_v39 = vpop.f32.mrb[6].mxu1  ;;  %715 = vmatpush3.bf16.msra.mxu0 %v714_v38 }
 0x121   :  { %v241_v40 = vpop.f32.mrb[7].mxu1  ;;  %716 = vmatprep.subr.bf16.mxu0 %v839_v28 }
 0x122   :  { %v717_v41 = vpack.c.bf16 %v611_v39, %v241_v40 }
 0x124   :  { %v622_v42 = vpop.f32.mrb[8].mxu1  ;;  %718 = vmatpush3.bf16.msra.mxu0 %v717_v41 }
 0x125   :  { %v321_v43 = vpop.f32.mrb[9].mxu1  ;;  %719 = vmatprep.subr.bf16.mxu0 %v839_v28 }
 0x126   :  { %v720_v44 = vpack.c.bf16 %v622_v42, %v321_v43 }
 0x128   :  { %v625_v45 = vpop.f32.mrb[10].mxu1  ;;  %721 = vmatpush3.bf16.msra.mxu0 %v720_v44 }
 0x129   :  { %v331_v46 = vpop.f32.mrb[11].mxu1  ;;  %722 = vmatprep.subr.bf16.mxu0 %v839_v28 }
 0x12a   :  { %v723_v47 = vpack.c.bf16 %v625_v45, %v331_v46 }
 0x12c   :  { %v636_v48 = vpop.f32.mrb[12].mxu1  ;;  %724 = vmatpush3.bf16.msra.mxu0 %v723_v47 }
 0x12d   :  { %v411_v49 = vpop.f32.mrb[13].mxu1  ;;  %725 = vmatprep.subr.bf16.mxu0 %v839_v28 }
 0x12e   :  { %v726_v50 = vpack.c.bf16 %v636_v48, %v411_v49 }
 0x130   :  { %v639_v51 = vpop.f32.mrb[14].mxu1  ;;  %727 = vmatpush3.bf16.msra.mxu0 %v726_v50 }
 0x131   :  { %v421_v52 = vpop.f32.mrb[15].mxu1  ;;  %728 = vmatprep.subr.bf16.mxu0 %v839_v28 }
 0x132   :  { %v729_v53 = vpack.c.bf16 %v639_v51, %v421_v52 }
 0x134   :  { %730 = vmatpush3.bf16.msra.mxu0 %v729_v53 }
 0x137   :  { %673 = vmatmul.mubr.f32.vlgmr.msra.gmra.mrb[0].mxu0 %v430_v54 }
 0x20a   :  { %v497_v55 = vpop.f32.mrb[0].mxu0 }
 0x20b   :  { %v501_v56 = vmul.f32 0.5, %v497_v55  ;;  %v674_v57 = vpop.f32.mrb[1].mxu0 }
 0x20d   :  { %502 = vst [vmem:[#allocation8] sm:$0xff] %v501_v56 }
 0x20e   :  { %817 = shalt.err (!%p814_p0)
}
 0x20f   :  { %s818_s25 = scalar_lea.hbm %s936_s3, 128 }
 0x210   :  { %p819_p1 = scmp.ne.s32.totalorder %s936_s3, %s818_s25  ;;  %p822_p2 = scmp.lt.u32.totalorder %s818_s25, %s936_s3 }
 0x212   :  { %p824_p3 = pnand %p822_p2, %p819_p1 }
 0x214   :  { %827 = shalt.err (!%p824_p3)
}
 0x215   :  { %512 = dma.vmem_to_hbm [thread:$0]  %s510_s21, 128, %s936_s3, [#allocation4]  }
 0x216   :  { %832 = dma.done.wait [#allocation4], 128  }
 0x217   :  { %833 = vsyncadd [#allocation4], 4294967168 }
 0x218   :  { %516 = vsyncpa [#allocation3], 1 }
 0x219   :  { %517 = vsyncpa [#allocation6], 1 }
 0x21a   :  { %518 = vsyncpa [#allocation4], 1 }

</bundles_post_ra>
